<compile_context>
chip_gen: v5e
topology: v5e:2x2
jax: 0.10.0
libtpu: 0.0.40
codegen_flags: <defaults>
</compile_context>

<pallas_src>
import jax
import jax.numpy as jnp
from jax.experimental import pallas as pl
from jax.experimental.pallas import tpu as pltpu

IN_FEATURES = 3
OUT_FEATURES = 1
_LANES = 128                              # batch elements per output lane-row
_PACKED_COLS = IN_FEATURES * _LANES       # 384: one row = 128 interleaved (x0,x1,x2) triples
_MAX_TILE_ROWS = 2048                     # 2048 * 128 = 262,144 batch rows / grid step (~4 MiB HBM)
_MIN_PALLAS_BATCH = _LANES                # below one full lane-row, plain XLA wins


def _linear_sigmoid_kernel(x_ref, m_ref, b_ref, o_ref):
    # x_ref: (tile_rows, 384) f32 VMEM -- natural (B,3) data, free-reshaped; 128 batch
    #        elements per sublane-row, features interleaved along lanes.
    # m_ref: (384, 128)       f32 VMEM -- de-interleave matrix, M[3j+f, j] = w[f]
    #        (constant index_map -> DMA'd into VMEM once, stays resident).
    # b_ref: (1, 128)         f32 VMEM -- bias broadcast across lanes.
    # o_ref: (tile_rows, 128) f32 VMEM -- fully lane- and sublane-dense output tile.
    y = jnp.dot(
        x_ref[...], m_ref[...],
        preferred_element_type=jnp.float32,
        precision=jax.lax.Precision.HIGHEST,   # true-f32 MXU path; matches reference to ~1e-7
    )
    # Sigmoid's exp/reciprocal run on the EUP slot over dense 8x128 vregs.
    o_ref[...] = jax.nn.sigmoid(y + b_ref[...]).astype(o_ref.dtype)


def my_model_forward(vec, weight, bias):
    """vec: (B, 3); weight: (1, 3) (PyTorch layout); bias: (1,). Returns (B, 1) f32."""
    vec = jnp.asarray(vec, jnp.float32)
    w = jnp.asarray(weight, jnp.float32).reshape(IN_FEATURES)
    b = jnp.asarray(bias, jnp.float32).reshape(OUT_FEATURES)
    B = vec.shape[0]

    if B < _MIN_PALLAS_BATCH:
        # Tiny batch: fixed pallas_call overhead dominates; fused XLA is strictly faster.
        return jax.nn.sigmoid(vec @ w[:, None] + b)

    # ---- static (Python-int) tiling arithmetic -------------------------------
    rows = pl.cdiv(B, _LANES)                 # sublane-rows of 128 batch elements
    if rows < 16:
        grid_rows, tile_rows = 1, rows        # block == full dim: (8,128) rule satisfied
    else:
        # >= 2 grid steps so both v7x TensorCores get work; cap tile at _MAX_TILE_ROWS.
        grid_rows = max(2, pl.cdiv(rows, _MAX_TILE_ROWS))
        tile_rows = ((pl.cdiv(rows, grid_rows) + 7) // 8) * 8   # multiple of 8 sublanes
        grid_rows = pl.cdiv(rows, tile_rows)
    rows_pad = grid_rows * tile_rows
    b_pad = rows_pad * _LANES

    if b_pad != B:
        # Ragged tail: zero-pad (padded rows produce sigmoid(b); sliced off below).
        vec = jnp.pad(vec, ((0, b_pad - B), (0, 0)))
    x2 = vec.reshape(rows_pad, _PACKED_COLS)  # FREE contiguous reshape, no transpose

    # De-interleave + linear in one matmul: M[3j+f, k] = w[f] * (j == k).
    eye = jnp.eye(_LANES, dtype=jnp.float32)                       # (128, 128)
    m = (w[None, :, None] * eye[:, None, :]).reshape(_PACKED_COLS, _LANES)
    b_row = jnp.broadcast_to(b, (1, _LANES)).astype(jnp.float32)   # (1, 128)

    out2 = pl.pallas_call(
        _linear_sigmoid_kernel,
        out_shape=jax.ShapeDtypeStruct((rows_pad, _LANES), jnp.float32),
        grid=(grid_rows,),
        in_specs=[
            pl.BlockSpec((tile_rows, _PACKED_COLS), lambda i: (i, 0)),  # activations
            pl.BlockSpec((_PACKED_COLS, _LANES), lambda i: (0, 0)),     # M (resident)
            pl.BlockSpec((1, _LANES), lambda i: (0, 0)),                # bias (resident)
        ],
        out_specs=pl.BlockSpec((tile_rows, _LANES), lambda i: (i, 0)),
        compiler_params=pltpu.CompilerParams(
            dimension_semantics=("parallel",),        # split row tiles across TCs on v7x
            vmem_limit_bytes=32 * 1024 * 1024,        # footprint ~8.5 MiB; headroom on v5e
        ),
        cost_estimate=pl.CostEstimate(
            flops=2 * rows_pad * _LANES * _PACKED_COLS,
            transcendentals=rows_pad * _LANES,
            bytes_accessed=4 * (rows_pad * _PACKED_COLS          # activations in
                                + _PACKED_COLS * _LANES + _LANES  # M + bias
                                + rows_pad * _LANES),             # output
        ),
    )(x2, m, b_row)

    out = out2.reshape(b_pad, OUT_FEATURES)   # free contiguous reshape back to (B_pad, 1)
    if b_pad != B:
        out = out[:B]
    return out


def _reference(vec, weight, bias):
    return jax.nn.sigmoid(vec @ weight.T + bias)


if __name__ == "__main__":
    key = jax.random.PRNGKey(0)
    k_x, k_w, k_b = jax.random.split(key, 3)

    # Deterministic "Linear" params (PyTorch shapes: weight (1, 3), bias (1,)).
    weight = jax.random.normal(k_w, (OUT_FEATURES, IN_FEATURES), dtype=jnp.float32) * 0.5
    bias = jax.random.normal(k_b, (OUT_FEATURES,), dtype=jnp.float32) * 0.1

    # B=256: Pallas path, exact multiple of 128.
    # B=300: Pallas path with ragged-tail padding.
    # B=8  : tiny-batch XLA fast path.
    for batch in (256, 300, 8):
        vec = jax.random.normal(jax.random.fold_in(k_x, batch),
                                (batch, IN_FEATURES), dtype=jnp.float32)
        out = jax.block_until_ready(my_model_forward(vec, weight, bias))
        ref = _reference(vec, weight, bias)
        assert out.shape == (batch, OUT_FEATURES)
        assert jnp.allclose(out, ref, atol=1e-5, rtol=1e-5), f"mismatch at B={batch}"

    print("KERNEL_OK")
</pallas_src>

<mosaic_0001>
module attributes {stable_mosaic.version = 11 : i64} {
  func.func @_linear_sigmoid_kernel(%arg0: i32, %arg1: memref<2x384xf32, #tpu.memory_space<vmem>>, %arg2: memref<384x128xf32, #tpu.memory_space<vmem>>, %arg3: memref<1x128xf32, #tpu.memory_space<vmem>>, %arg4: memref<2x128xf32, #tpu.memory_space<vmem>>) attributes {dimension_semantics = [#tpu.dimension_semantics<parallel>], iteration_bounds = array<i64: 1>, scalar_prefetch = 0 : i64, scratch_operands = 0 : i64, tpu.core_type = #tpu.core_type<tc>, window_params = [{transform_indices = @transform_0, window_bounds = array<i64: 2, 384>}, {pipeline_mode = #tpu.pipeline_mode<synchronous>, transform_indices = @transform_1, window_bounds = array<i64: 384, 128>}, {pipeline_mode = #tpu.pipeline_mode<synchronous>, transform_indices = @transform_2, window_bounds = array<i64: 1, 128>}, {transform_indices = @transform_3, window_bounds = array<i64: 2, 128>}]} {
    %c0 = arith.constant 0 : index
    %c0_0 = arith.constant 0 : index
    %0 = vector.load %arg1[%c0, %c0_0] : memref<2x384xf32, #tpu.memory_space<vmem>>, vector<2x384xf32>
    %c0_1 = arith.constant 0 : index
    %c0_2 = arith.constant 0 : index
    %1 = vector.load %arg2[%c0_1, %c0_2] : memref<384x128xf32, #tpu.memory_space<vmem>>, vector<384x128xf32>
    %cst = arith.constant dense<0.000000e+00> : vector<2x128xf32>
    %2 = tpu.matmul %0, %1, %cst {dimension_numbers = #tpu.dot_dimension_numbers<[1], [0], [0], [1], [0, 0, 1, 1], [], []>, precision = #tpu.contract_precision<fp32>} : vector<2x384xf32>, vector<384x128xf32>, vector<2x128xf32> -> vector<2x128xf32>
    %c0_3 = arith.constant 0 : index
    %c0_4 = arith.constant 0 : index
    %3 = vector.load %arg3[%c0_3, %c0_4] : memref<1x128xf32, #tpu.memory_space<vmem>>, vector<1x128xf32>
    %4 = vector.broadcast %3 : vector<1x128xf32> to vector<2x128xf32>
    %5 = arith.addf %2, %4 : vector<2x128xf32>
    %6 = arith.negf %5 : vector<2x128xf32>
    %7 = math.exp %6 : vector<2x128xf32>
    %cst_5 = arith.constant 1.000000e+00 : f32
    %8 = vector.broadcast %cst_5 : f32 to vector<2x128xf32>
    %9 = arith.addf %8, %7 : vector<2x128xf32>
    %10 = arith.divf %8, %9 : vector<2x128xf32>
    %c0_6 = arith.constant 0 : index
    %c0_7 = arith.constant 0 : index
    %11 = vector.load %arg4[%c0_6, %c0_7] : memref<2x128xf32, #tpu.memory_space<vmem>>, vector<2x128xf32>
    tpu.vector_store %arg4[%c0_6, %c0_7], %10 {strides = array<i32>} : memref<2x128xf32, #tpu.memory_space<vmem>>, vector<2x128xf32>,
    return
  }
  func.func @transform_0(%arg0: i32) -> (i32, i32) {
    %c0_i32 = arith.constant 0 : i32
    %c0_i32_0 = arith.constant 0 : i32
    return %arg0, %c0_i32 : i32, i32
  }
  func.func @transform_1(%arg0: i32) -> (i32, i32) {
    %c0_i32 = arith.constant 0 : i32
    %c0_i32_0 = arith.constant 0 : i32
    %c0_i32_1 = arith.constant 0 : i32
    return %c0_i32, %c0_i32_0 : i32, i32
  }
  func.func @transform_2(%arg0: i32) -> (i32, i32) {
    %c0_i32 = arith.constant 0 : i32
    %c0_i32_0 = arith.constant 0 : i32
    %c0_i32_1 = arith.constant 0 : i32
    return %c0_i32, %c0_i32_0 : i32, i32
  }
  func.func @transform_3(%arg0: i32) -> (i32, i32) {
    %c0_i32 = arith.constant 0 : i32
    %c0_i32_0 = arith.constant 0 : i32
    return %arg0, %c0_i32 : i32, i32
  }
}

</mosaic_0001>

<bundles_post_ra>
// kernel: tpu_custom_call.1
= control target key start
LH: loop header
LB: loop body
LE: loop exit
PB: predicated region body
PF: predicated region fallthrough
CT: control target
= control target key end

     0   :  { %8 = vsyncpa [#allocation3], 0  ;;  %s2042_s0 = inlined_call_operand.hbm [shape: f32[2,384], index: 0, kind: input, shape index: {}]   ;;  %s2043_s1 = inlined_call_operand.hbm [shape: f32[384,128], index: 1, kind: input, shape index: {}]   ;;  %s2044_s2 = inlined_call_operand.vmem [shape: f32[1,128], index: 2, kind: input, shape index: {}]   ;;  %s2045_s3 = inlined_call_operand.hbm [shape: f32[2,128], index: 3, kind: output, shape index: {}]  }
   0x1   :  { %9 = vsyncpa [#allocation6], 0 }
   0x2   :  { %10 = vsyncpa [#allocation4], 0  ;;  %s16_s14 = sshll.u32 %s2042_s0, 4  ;;  %s1256_s15 = smov [#allocation2]   ;;  %s17_s14 = int_to_ptr.hbm [resolvable:$true] %s16_s14 }
   0x3   :  { %s18_s16 = sshll.u32 %s1256_s15, 4  ;;  %s26_s19 = sshll.u32 %s2043_s1, 4  ;;  %s19_s16 = int_to_ptr.vmem [resolvable:$true] %s18_s16  ;;  %s27_s19 = int_to_ptr.hbm [resolvable:$true] %s26_s19 }
   0x4   :  { %21 = dma.hbm_to_vmem [thread:$0]  %s17_s14, 96, %s19_s16, [#allocation3]  }
   0x5   :  { %s1257_s20 = smov [#allocation5]   ;;  %s1258_s22 = smov 128  }
   0x6   :  { %s28_s21 = sshll.u32 %s1257_s20, 4  ;;  %s1259_s23 = smov 8   ;;  %s29_s21 = int_to_ptr.vmem [resolvable:$true] %s28_s21 }
   0x7   :  { %34 = dma.hbm_to_vmem [thread:$0]  %s27_s19, 6144, %s29_s21, [#allocation6], %s1258_s22, %s1258_s22, %s1259_s23  }
   0x8   :  { %1250 = dma.done.wait [#allocation3], 96  }
   0x9   :  { %1251 = vsyncadd [#allocation3], 4294967200 }
   0xa   :  { %1252 = dma.done.wait [#allocation6], 6144  }
   0xb   :  { %1253 = vsyncadd [#allocation6], 4294961152  ;;  %v61_v0 = vld [vmem:[#allocation5 + $0x78] sm:$0xff]  ;;  %v60_v1 = vld [vmem:[#allocation5 + $0x70] sm:$0xff]  ;;  %s1156_s27 = sshll.u32 %s2045_s3, 4  ;;  %s1157_s27 = int_to_ptr.hbm [resolvable:$true] %s1156_s27 }
   0xc   :  { %v59_v2 = vld [vmem:[#allocation5 + $0x68] sm:$0xff]  ;;  %v1287_v3 = vand.u32 4294901760, %v61_v0  ;;  %v1289_v4 = vand.u32 4294901760, %v60_v1  ;;  %v58_v6 = vld [vmem:[#allocation5 + $0x60] sm:$0xff]  ;;  %v57_v7 = vld [vmem:[#allocation5 + $0x58] sm:$0xff] }
   0xd   :  { %v1291_v5 = vand.u32 4294901760, %v59_v2  ;;  %v56_v8 = vld [vmem:[#allocation5 + $0x50] sm:$0xff]  ;;  %v1293_v9 = vand.u32 4294901760, %v58_v6  ;;  %v1295_v10 = vand.u32 4294901760, %v57_v7  ;;  %v55_v12 = vld [vmem:[#allocation5 + $0x48] sm:$0xff]  ;;  %v54_v13 = vld [vmem:[#allocation5 + $0x40] sm:$0xff] }
   0xe   :  { %v1297_v11 = vand.u32 4294901760, %v56_v8  ;;  %107 = vmatpush.msra.mxu0 %v1287_v3  ;;  %v1301_v14 = vsub.f32 %v61_v0, %v1287_v3  ;;  %v1304_v15 = vsub.f32 %v60_v1, %v1289_v4  ;;  %303 = vmatpush.msra.mxu3 %v1287_v3  ;;  %v1310_v17 = vand.u32 4294901760, %v55_v12  ;;  %v53_v21 = vld [vmem:[#allocation5 + $0x38] sm:$0xff]  ;;  %v52_v26 = vld [vmem:[#allocation5 + $0x30] sm:$0xff]  ;;  %v51_v36 = vld [vmem:[#allocation5 + $0x28] sm:$0xff] }
   0xf   :  { %v1308_v16 = vsub.f32 %v59_v2, %v1291_v5  ;;  %v1313_v18 = vsub.f32 %v58_v6, %v1293_v9  ;;  %v1316_v19 = vsub.f32 %v57_v7, %v1295_v10  ;;  %v1326_v25 = vand.u32 4294901760, %v54_v13  ;;  %v50_v42 = vld [vmem:[#allocation5 + $0x20] sm:$0xff]  ;;  %v49_v47 = vld [vmem:[#allocation5 + $0x18] sm:$0xff]  ;;  %v48_v54 = vld [vmem:[#allocation5 + $0x10] sm:$0xff] }
  0x10   :  { %v1319_v20 = vsub.f32 %v56_v8, %v1297_v11  ;;  %109 = vmatpush.msra.mxu0 %v1289_v4  ;;  %250 = vmatpush.msra.mxu2 %v1301_v14  ;;  %v149_v22 = vand.u32 4294901760, %v1301_v14  ;;  %v2061_v23 = vand.u32 4294901760, %v1304_v15  ;;  %v1332_v29 = vsub.f32 %v55_v12, %v1310_v17  ;;  %v45_v55 = vld [vmem:[#allocation2] sm:$0x3f]  ;;  %v47_v62 = vld [vmem:[#allocation5 + $0x8] sm:$0xff]  ;;  %v46_v6 = vld [vmem:[#allocation5] sm:$0xff] }
  0x11   :  { %v2059_v24 = vand.u32 4294901760, %v1308_v16  ;;  %305 = vmatpush.msra.mxu3 %v1289_v4  ;;  %v2058_v27 = vand.u32 4294901760, %v1313_v18  ;;  %v2055_v28 = vand.u32 4294901760, %v1316_v19  ;;  %v1345_v33 = vand.u32 4294901760, %v53_v21  ;;  %v77_v60 = vld [vmem:[#allocation5 + $0xf8] sm:$0xff]  ;;  %v76_v7 = vld [vmem:[#allocation5 + $0xf0] sm:$0xff] }
  0x12   :  { %111 = vmatpush.msra.mxu0 %v1291_v5  ;;  %253 = vmatpush.msra.mxu2 %v1304_v15  ;;  %v150_v30 = vsub.f32 %v1301_v14, %v149_v22  ;;  %v156_v31 = vsub.f32 %v1304_v15, %v2061_v23  ;;  %v1348_v34 = vand.u32 4294901760, %v52_v26  ;;  %v2053_v35 = vand.u32 4294901760, %v1319_v20  ;;  %99 = vst [vmem:[#allocation1] ss:$4 sm:$0xff] %v45_v55 }
  0x13   :  { %v162_v32 = vsub.f32 %v1308_v16, %v2059_v24  ;;  %307 = vmatpush.msra.mxu3 %v1291_v5  ;;  %v168_v39 = vsub.f32 %v1313_v18, %v2058_v27  ;;  %v1357_v40 = vsub.f32 %v54_v13, %v1326_v25  ;;  %v174_v41 = vsub.f32 %v1316_v19, %v2055_v28 }
  0x14   :  { %113 = vmatpush.msra.mxu0 %v1293_v9  ;;  %v151_v37 = vand.u32 4294901760, %v150_v30  ;;  %256 = vmatpush.msra.mxu2 %v1308_v16  ;;  %v157_v38 = vand.u32 4294901760, %v156_v31  ;;  %v1364_v44 = vand.u32 4294901760, %v51_v36  ;;  %v2052_v45 = vand.u32 4294901760, %v1332_v29 }
  0x15   :  { %309 = vmatpush.msra.mxu3 %v1293_v9  ;;  %v163_v43 = vand.u32 4294901760, %v162_v32  ;;  %v1368_v46 = vsub.f32 %v53_v21, %v1345_v33  ;;  %v180_v48 = vsub.f32 %v1319_v20, %v2053_v35  ;;  %v169_v49 = vand.u32 4294901760, %v168_v39 }
  0x16   :  { %115 = vmatpush.msra.mxu0 %v1295_v10  ;;  %152 = vmatpush.msra.mxu1 %v151_v37  ;;  %v1376_v50 = vand.u32 4294901760, %v50_v42  ;;  %v2051_v51 = vand.u32 4294901760, %v1357_v40  ;;  %v1380_v52 = vsub.f32 %v52_v26, %v1348_v34  ;;  %v1384_v53 = vand.u32 4294901760, %v49_v47 }
  0x17   :  { %259 = vmatpush.msra.mxu2 %v1313_v18  ;;  %311 = vmatpush.msra.mxu3 %v1295_v10  ;;  %v175_v56 = vand.u32 4294901760, %v174_v41  ;;  %v186_v57 = vsub.f32 %v1332_v29, %v2052_v45  ;;  %v2050_v58 = vand.u32 4294901760, %v1368_v46  ;;  %v1392_v59 = vsub.f32 %v51_v36, %v1364_v44  ;;  %v75_v36 = vld [vmem:[#allocation5 + $0xe8] sm:$0xff]  ;;  %v70_v45 = vld [vmem:[#allocation5 + $0xc0] sm:$0xff] }
  0x18   :  { %117 = vmatpush.msra.mxu0 %v1297_v11  ;;  %158 = vmatpush.msra.mxu1 %v157_v38  ;;  %v181_v61 = vand.u32 4294901760, %v180_v48  ;;  %v192_v63 = vsub.f32 %v1357_v40, %v2051_v51  ;;  %v1400_v0 = vand.u32 4294901760, %v48_v54  ;;  %v2049_v1 = vand.u32 4294901760, %v1380_v52 }
  0x19   :  { %262 = vmatpush.msra.mxu2 %v1316_v19  ;;  %313 = vmatpush.msra.mxu3 %v1297_v11  ;;  %v1404_v2 = vsub.f32 %v50_v42, %v1376_v50  ;;  %v1409_v8 = vsub.f32 %v49_v47, %v1384_v53  ;;  %v1411_v12 = vand.u32 4294901760, %v77_v60  ;;  %v187_v13 = vand.u32 4294901760, %v186_v57  ;;  %v74_v47 = vld [vmem:[#allocation5 + $0xe0] sm:$0xff] }
  0x1a   :  { %119 = vmatpush.msra.mxu0 %v1310_v17  ;;  %164 = vmatpush.msra.mxu1 %v163_v43  ;;  %v198_v21 = vsub.f32 %v1368_v46, %v2050_v58  ;;  %v1417_v26 = vand.u32 4294901760, %v47_v62  ;;  %v2047_v30 = vand.u32 4294901760, %v1392_v59  ;;  %v1422_v31 = vand.u32 4294901760, %v46_v6  ;;  %v71_v58 = vld [vmem:[#allocation5 + $0xc8] sm:$0xff] }
  0x1b   :  { %265 = vmatpush.msra.mxu2 %v1319_v20  ;;  %315 = vmatpush.msra.mxu3 %v1310_v17  ;;  %v1424_v32 = vand.u32 4294901760, %v76_v7  ;;  %v193_v37 = vand.u32 4294901760, %v192_v63  ;;  %v204_v38 = vsub.f32 %v1380_v52, %v2049_v1  ;;  %v2046_v39 = vand.u32 4294901760, %v1404_v2 }
  0x1c   :  { %121 = vmatpush.msra.mxu0 %v1326_v25  ;;  %170 = vmatpush.msra.mxu1 %v169_v49  ;;  %2064 = vst [vmem:[#allocation11_spill] sm:$0xff] %v1422_v31  ;;  %v1432_v41 = vsub.f32 %v48_v54, %v1400_v0  ;;  %v2048_v42 = vand.u32 4294901760, %v1409_v8  ;;  %v1438_v43 = vsub.f32 %v77_v60, %v1411_v12  ;;  %v199_v48 = vand.u32 4294901760, %v198_v21  ;;  %v73_v60 = vld [vmem:[#allocation5 + $0xd8] sm:$0xff]  ;;  %v72_v21 = vld [vmem:[#allocation5 + $0xd0] sm:$0xff] }
  0x1d   :  { %268 = vmatpush.msra.mxu2 %v1332_v29  ;;  %317 = vmatpush.msra.mxu3 %v1326_v25  ;;  %v210_v49 = vsub.f32 %v1392_v59, %v2047_v30  ;;  %v1445_v54 = vsub.f32 %v47_v62, %v1417_v26  ;;  %v1447_v55 = vand.u32 4294901760, %v75_v36  ;;  %v1455_v57 = vsub.f32 %v76_v7, %v1424_v32 }
  0x1e   :  { %123 = vmatpush.msra.mxu0 %v1345_v33  ;;  %176 = vmatpush.msra.mxu1 %v175_v56  ;;  %v1452_v56 = vsub.f32 %v46_v6, %v1422_v31  ;;  %v216_v62 = vsub.f32 %v1404_v2, %v2046_v39  ;;  %v2054_v63 = vand.u32 4294901760, %v1432_v41  ;;  %v222_v6 = vsub.f32 %v1409_v8, %v2048_v42 }
  0x1f   :  { %271 = vmatpush.msra.mxu2 %v1357_v40  ;;  %319 = vmatpush.msra.mxu3 %v1345_v33  ;;  %v2056_v7 = vand.u32 4294901760, %v1438_v43  ;;  %v1473_v39 = vsub.f32 %v75_v36, %v1447_v55  ;;  %v1475_v30 = vand.u32 4294901760, %v73_v60  ;;  %v2060_v1 = vand.u32 4294901760, %v1455_v57 }
  0x20   :  { %125 = vmatpush.msra.mxu0 %v1348_v34  ;;  %182 = vmatpush.msra.mxu1 %v181_v61  ;;  %v205_v61 = vand.u32 4294901760, %v204_v38  ;;  %v2057_v38 = vand.u32 4294901760, %v1445_v54  ;;  %v2062_v42 = vand.u32 4294901760, %v1452_v56  ;;  %v228_v36 = vsub.f32 %v1432_v41, %v2054_v63 }
  0x21   :  { %274 = vmatpush.msra.mxu2 %v1368_v46  ;;  %321 = vmatpush.msra.mxu3 %v1348_v34  ;;  %v1488_v51 = vand.u32 4294901760, %v72_v21  ;;  %v223_v35 = vand.u32 4294901760, %v222_v6  ;;  %v1501_v63 = vsub.f32 %v73_v60, %v1475_v30  ;;  %v1503_v28 = vand.u32 4294901760, %v71_v58  ;;  %v69_v6 = vld [vmem:[#allocation5 + $0xb8] sm:$0xff] }
  0x22   :  { %127 = vmatpush.msra.mxu0 %v1364_v44  ;;  %188 = vmatpush.msra.mxu1 %v187_v13  ;;  %v1462_v13 = vand.u32 4294901760, %v74_v47  ;;  %v240_v60 = vsub.f32 %v1452_v56, %v2062_v42  ;;  %v1523_v23 = vand.u32 4294901760, %v69_v6  ;;  %v2066_v14 = vand.u32 4294901760, %v1304_v15 }
  0x23   :  { %277 = vmatpush.msra.mxu2 %v1380_v52  ;;  %323 = vmatpush.msra.mxu3 %v1364_v44  ;;  %v1518_v24 = vsub.f32 %v72_v21, %v1488_v51  ;;  %v1531_v27 = vsub.f32 %v71_v58, %v1503_v28  ;;  %v2068_v15 = vand.u32 4294901760, %v1308_v16  ;;  %v2070_v16 = vand.u32 4294901760, %v1313_v18 }
  0x24   :  { %129 = vmatpush.msra.mxu0 %v1376_v50  ;;  %194 = vmatpush.msra.mxu1 %v193_v37  ;;  %v211_v37 = vand.u32 4294901760, %v210_v49  ;;  %v1486_v49 = vsub.f32 %v74_v47, %v1462_v13  ;;  %v234_v47 = vsub.f32 %v1445_v54, %v2057_v38  ;;  %v229_v38 = vand.u32 4294901760, %v228_v36 }
  0x25   :  { %280 = vmatpush.msra.mxu2 %v1392_v59  ;;  %325 = vmatpush.msra.mxu3 %v1376_v50  ;;  %v2065_v36 = vand.u32 4294901760, %v1473_v39  ;;  %v2072_v18 = vand.u32 4294901760, %v1316_v19  ;;  %v2074_v19 = vand.u32 4294901760, %v1319_v20  ;;  %v2076_v20 = vand.u32 4294901760, %v1332_v29 }
  0x26   :  { %131 = vmatpush.msra.mxu0 %v1384_v53  ;;  %200 = vmatpush.msra.mxu1 %v199_v48  ;;  %v217_v48 = vand.u32 4294901760, %v216_v62  ;;  %v68_v62 = vld [vmem:[#allocation5 + $0xb0] sm:$0xff]  ;;  %v2078_v29 = vand.u32 4294901760, %v1357_v40  ;;  %v2080_v40 = vand.u32 4294901760, %v1368_v46  ;;  %v2082_v46 = vand.u32 4294901760, %v1380_v52 }
  0x27   :  { %283 = vmatpush.msra.mxu2 %v1404_v2  ;;  %327 = vmatpush.msra.mxu3 %v1384_v53  ;;  %v503_v42 = vsub.f32 %v1473_v39, %v2065_v36  ;;  %v2067_v36 = vand.u32 4294901760, %v1486_v49 }
  0x28   :  { %133 = vmatpush.msra.mxu0 %v1400_v0  ;;  %206 = vmatpush.msra.mxu1 %v205_v61  ;;  %v491_v61 = vsub.f32 %v1438_v43, %v2056_v7  ;;  %v1510_v7 = vand.u32 4294901760, %v70_v45 }
  0x29   :  { %286 = vmatpush.msra.mxu2 %v1409_v8  ;;  %329 = vmatpush.msra.mxu3 %v1400_v0  ;;  %v509_v21 = vsub.f32 %v1486_v49, %v2067_v36 }
  0x2a   :  { %135 = vmatpush.msra.mxu0 %v1417_v26  ;;  %212 = vmatpush.msra.mxu1 %v211_v37  ;;  %v497_v37 = vsub.f32 %v1455_v57, %v2060_v1  ;;  %v492_v1 = vand.u32 4294901760, %v491_v61  ;;  %v67_v61 = vld [vmem:[#allocation5 + $0xa8] sm:$0xff] }
  0x2b   :  { %289 = vmatpush.msra.mxu2 %v1432_v41  ;;  %331 = vmatpush.msra.mxu3 %v1417_v26  ;;  %v1556_v58 = vand.u32 4294901760, %v67_v61 }
  0x2c   :  { %137 = vmatpush.msra.mxu0 %v1422_v31  ;;  %218 = vmatpush.msra.mxu1 %v217_v48  ;;  %v235_v48 = vand.u32 4294901760, %v234_v47  ;;  %v241_v47 = vand.u32 4294901760, %v240_v60  ;;  %v2069_v60 = vand.u32 4294901760, %v1501_v63 }
  0x2d   :  { %292 = vmatpush.msra.mxu2 %v1445_v54  ;;  %333 = vmatpush.msra.mxu3 %v1422_v31  ;;  %v1544_v31 = vand.u32 4294901760, %v68_v62 }
  0x2e   :  { %344 = vmatpush.msrb.mxu0 %v149_v22  ;;  %224 = vmatpush.msra.mxu1 %v223_v35  ;;  %v498_v22 = vand.u32 4294901760, %v497_v37  ;;  %v1537_v35 = vsub.f32 %v70_v45, %v1510_v7  ;;  %v1549_v45 = vsub.f32 %v69_v6, %v1523_v23  ;;  %v66_v37 = vld [vmem:[#allocation5 + $0xa0] sm:$0xff]  ;;  %v65_v6 = vld [vmem:[#allocation5 + $0x98] sm:$0xff] }
  0x2f   :  { %295 = vmatpush.msra.mxu2 %v1452_v56  ;;  %493 = vmatpush.msrb.mxu3 %v492_v1  ;;  %v1568_v36 = vand.u32 4294901760, %v66_v37  ;;  %v1581_v1 = vand.u32 4294901760, %v65_v6 }
  0x30   :  { %348 = vmatpush.msrb.mxu0 %v2066_v14  ;;  %230 = vmatpush.msra.mxu1 %v229_v38  ;;  %v504_v38 = vand.u32 4294901760, %v503_v42  ;;  %v515_v14 = vsub.f32 %v1501_v63, %v2069_v60  ;;  %v2071_v42 = vand.u32 4294901760, %v1518_v24  ;;  %v1566_v60 = vsub.f32 %v68_v62, %v1544_v31 }
  0x31   :  { %448 = vmatpush.msrb.mxu2 %v1411_v12  ;;  %499 = vmatpush.msrb.mxu3 %v498_v22  ;;  %v1579_v62 = vsub.f32 %v67_v61, %v1556_v58  ;;  %v1592_v61 = vsub.f32 %v66_v37, %v1568_v36 }
  0x32   :  { %352 = vmatpush.msrb.mxu0 %v2068_v15  ;;  %236 = vmatpush.msra.mxu1 %v235_v48  ;;  %v510_v48 = vand.u32 4294901760, %v509_v21  ;;  %v521_v15 = vsub.f32 %v1518_v24, %v2071_v42  ;;  %v516_v21 = vand.u32 4294901760, %v515_v14 }
  0x33   :  { %450 = vmatpush.msrb.mxu2 %v1424_v32  ;;  %505 = vmatpush.msrb.mxu3 %v504_v38  ;;  %v64_v38 = vld [vmem:[#allocation5 + $0x90] sm:$0xff] }
  0x34   :  { %356 = vmatpush.msrb.mxu0 %v2070_v16  ;;  %242 = vmatpush.msra.mxu1 %v241_v47  ;;  %v100_v47 = vld.sshfl [vmem:[#allocation1] sm:$0xff pattern:$0x73625140]  ;;  %v2073_v16 = vand.u32 4294901760, %v1531_v27  ;;  %v522_v14 = vand.u32 4294901760, %v521_v15  ;;  %v1604_v37 = vand.u32 4294901760, %v64_v38 }
  0x35   :  { %452 = vmatpush.msrb.mxu2 %v1447_v55  ;;  %511 = vmatpush.msrb.mxu3 %v510_v48  ;;  %v1594_v22 = vand.u32 4294901760, %v100_v47 }
  0x36   :  { %360 = vmatpush.msrb.mxu0 %v2072_v18  ;;  %411 = vmatpush.msrb.mxu1 %v1287_v3  ;;  %v527_v42 = vsub.f32 %v1531_v27, %v2073_v16  ;;  %v2075_v3 = vand.u32 4294901760, %v1537_v35  ;;  %v1607_v16 = vsub.f32 %v65_v6, %v1581_v1 }
  0x37   :  { %454 = vmatpush.msrb.mxu2 %v1462_v13  ;;  %517 = vmatpush.msrb.mxu3 %v516_v21  ;;  %v2079_v21 = vand.u32 4294901760, %v1566_v60  ;;  %v1618_v15 = vsub.f32 %v100_v47, %v1594_v22  ;;  %v1631_v47 = vsub.f32 %v64_v38, %v1604_v37 }
  0x38   :  { %364 = vmatpush.msrb.mxu0 %v2074_v19  ;;  %413 = vmatpush.msrb.mxu1 %v1289_v4  ;;  %v533_v18 = vsub.f32 %v1537_v35, %v2075_v3  ;;  %v2077_v4 = vand.u32 4294901760, %v1549_v45  ;;  %v63_v3 = vld [vmem:[#allocation5 + $0x88] sm:$0xff]  ;;  %v528_v48 = vand.u32 4294901760, %v527_v42 }
  0x39   :  { %456 = vmatpush.msrb.mxu2 %v1475_v30  ;;  %523 = vmatpush.msrb.mxu3 %v522_v14  ;;  %v545_v42 = vsub.f32 %v1566_v60, %v2079_v21  ;;  %v1620_v6 = vand.u32 4294901760, %v63_v3 }
  0x3a   :  { %368 = vmatpush.msrb.mxu0 %v2076_v20  ;;  %415 = vmatpush.msrb.mxu1 %v1291_v5  ;;  %v539_v19 = vsub.f32 %v1549_v45, %v2077_v4  ;;  %v534_v5 = vand.u32 4294901760, %v533_v18  ;;  %v62_v20 = vld [vmem:[#allocation5 + $0x80] sm:$0xff]  ;;  %v556_v4 = vand.u32 4294901760, %v1592_v61  ;;  %v2081_v18 = vand.u32 4294901760, %v1579_v62 }
  0x3b   :  { %458 = vmatpush.msrb.mxu2 %v1488_v51  ;;  %529 = vmatpush.msrb.mxu3 %v528_v48  ;;  %v1633_v21 = vand.u32 4294901760, %v62_v20  ;;  %v140_v48 = vand.u32 4294901760, %v1618_v15  ;;  %v1644_v38 = vsub.f32 %v63_v3, %v1620_v6  ;;  %v2084_v3 = vand.u32 4294901760, %v1404_v2 }
  0x3c   :  { %372 = vmatpush.msrb.mxu0 %v2078_v29  ;;  %417 = vmatpush.msrb.mxu1 %v1293_v9  ;;  %v540_v9 = vand.u32 4294901760, %v539_v19  ;;  %v551_v14 = vsub.f32 %v1579_v62, %v2081_v18  ;;  %v562_v29 = vand.u32 4294901760, %v1607_v16  ;;  %v557_v19 = vsub.f32 %v1592_v61, %v556_v4 }
  0x3d   :  { %460 = vmatpush.msrb.mxu2 %v1503_v28  ;;  %535 = vmatpush.msrb.mxu3 %v534_v5  ;;  %v568_v5 = vand.u32 4294901760, %v1631_v47  ;;  %v574_v18 = vand.u32 4294901760, %v1644_v38 }
  0x3e   :  { %376 = vmatpush.msrb.mxu0 %v2080_v40  ;;  %419 = vmatpush.msrb.mxu1 %v1295_v10  ;;  %v546_v10 = vand.u32 4294901760, %v545_v42  ;;  %v2083_v40 = vand.u32 4294901760, %v1392_v59  ;;  %v563_v52 = vsub.f32 %v1607_v16, %v562_v29  ;;  %v1655_v42 = vsub.f32 %v62_v20, %v1633_v21  ;;  %v101_v59 = vld.sshfl [vmem:[#allocation1 + $0x8] sm:$0xff pattern:$0x73625140] }
  0x3f   :  { %462 = vmatpush.msrb.mxu2 %v1510_v7  ;;  %541 = vmatpush.msrb.mxu3 %v540_v9  ;;  %v141_v9 = vsub.f32 %v1618_v15, %v140_v48 }
  0x40   :  { %380 = vmatpush.msrb.mxu0 %v2082_v46  ;;  %421 = vmatpush.msrb.mxu1 %v1297_v11  ;;  %v552_v11 = vand.u32 4294901760, %v551_v14  ;;  %v2085_v14 = vand.u32 4294901760, %v1409_v8  ;;  %v564_v2 = vand.u32 4294901760, %v563_v52  ;;  %v580_v20 = vand.u32 4294901760, %v1655_v42 }
  0x41   :  { %464 = vmatpush.msrb.mxu2 %v1523_v23  ;;  %547 = vmatpush.msrb.mxu3 %v546_v10  ;;  %v1671_v46 = vand.u32 4294901760, %v101_v59  ;;  %v2086_v10 = vand.u32 4294901760, %v1432_v41  ;;  %v575_v8 = vsub.f32 %v1644_v38, %v574_v18 }
  0x42   :  { %384 = vmatpush.msrb.mxu0 %v2083_v40  ;;  %423 = vmatpush.msrb.mxu1 %v1310_v17  ;;  %v558_v17 = vand.u32 4294901760, %v557_v19  ;;  %v2087_v19 = vand.u32 4294901760, %v1445_v54 }
  0x43   :  { %466 = vmatpush.msrb.mxu2 %v1544_v31  ;;  %553 = vmatpush.msrb.mxu3 %v552_v11  ;;  %v1688_v40 = vsub.f32 %v101_v59, %v1671_v46  ;;  %v2088_v11 = vand.u32 4294901760, %v1452_v56  ;;  %v2091_v56 = vld [vmem:[#allocation11_spill] sm:$0xff] }
  0x44   :  { %388 = vmatpush.msrb.mxu0 %v2084_v3  ;;  %425 = vmatpush.msrb.mxu1 %v1326_v25  ;;  %v569_v25 = vsub.f32 %v1631_v47, %v568_v5 }
  0x45   :  { %468 = vmatpush.msrb.mxu2 %v1556_v58  ;;  %559 = vmatpush.msrb.mxu3 %v558_v17  ;;  %v481_v52 = vand.u32 4294901760, %v1688_v40 }
  0x46   :  { %392 = vmatpush.msrb.mxu0 %v2085_v14  ;;  %427 = vmatpush.msrb.mxu1 %v1345_v33  ;;  %v142_v33 = vand.u32 4294901760, %v141_v9  ;;  %v570_v41 = vand.u32 4294901760, %v569_v25  ;;  %v84_v9 = vld [vmem:[#allocation5 + $0x130] sm:$0xff] }
  0x47   :  { %470 = vmatpush.msrb.mxu2 %v1568_v36  ;;  %565 = vmatpush.msrb.mxu3 %v564_v2 }
  0x48   :  { %396 = vmatpush.msrb.mxu0 %v2086_v10  ;;  %429 = vmatpush.msrb.mxu1 %v1348_v34  ;;  %v581_v34 = vsub.f32 %v1655_v42, %v580_v20 }
  0x49   :  { %472 = vmatpush.msrb.mxu2 %v1581_v1  ;;  %143 = vmatmul.f32.vlgmr.msra.gmra.mxu0 %v142_v33  ;;  %v1856_v33 = vand.u32 4294901760, %v84_v9 }
  0x4a   :  { %400 = vmatpush.msrb.mxu0 %v2087_v19  ;;  %431 = vmatpush.msrb.mxu1 %v1364_v44  ;;  %v576_v44 = vand.u32 4294901760, %v575_v8  ;;  %v582_v54 = vand.u32 4294901760, %v581_v34 }
  0x4b   :  { %474 = vmatpush.msrb.mxu2 %v1604_v37  ;;  %571 = vmatpush.msrb.mxu3 %v570_v41 }
  0x4c   :  { %404 = vmatpush.msrb.mxu0 %v2088_v11  ;;  %433 = vmatpush.msrb.mxu1 %v1376_v50  ;;  %v2089_v50 = vand.u32 4294901760, %v1438_v43 }
  0x4d   :  { %476 = vmatpush.msrb.mxu2 %v1620_v6  ;;  %577 = vmatpush.msrb.mxu3 %v576_v44 }
  0x4e   :  { %591 = vmatpush.msra.mxu0 %v1438_v43  ;;  %435 = vmatpush.msrb.mxu1 %v1384_v53  ;;  %v482_v53 = vsub.f32 %v1688_v40, %v481_v52 }
  0x4f   :  { %478 = vmatpush.msrb.mxu2 %v1633_v21  ;;  %583 = vmatpush.msrb.mxu3 %v582_v54 }
  0x50   :  { %594 = vmatpush.msra.mxu0 %v1455_v57  ;;  %437 = vmatpush.msrb.mxu1 %v1400_v0  ;;  %v2090_v0 = vand.u32 4294901760, %v1455_v57  ;;  %v483_v43 = vand.u32 4294901760, %v482_v53  ;;  %v2093_v57 = vand.u32 4294901760, %v1486_v49 }
  0x51   :  { %298 = vmatmul.f32.vlgmr.msra.gmra.mxu2 %v1618_v15  ;;  %337 = vmatmul.f32.vlgmr.msra.gmra.mxu3 %v140_v48 }
  0x52   :  { %597 = vmatpush.msra.mxu0 %v1473_v39  ;;  %685 = vmatpush.msra.mxu2 %v2089_v50 }
  0x53   :  { %439 = vmatpush.msrb.mxu1 %v1417_v26  ;;  %752 = vmatpush.msra.mxu3 %v1411_v12  ;;  %v2092_v26 = vand.u32 4294901760, %v1473_v39  ;;  %v2094_v39 = vand.u32 4294901760, %v1501_v63 }
  0x54   :  { %600 = vmatpush.msra.mxu0 %v1486_v49  ;;  %689 = vmatpush.msra.mxu2 %v2090_v0 }
  0x55   :  { %441 = vmatpush.msrb.mxu1 %v2091_v56  ;;  %754 = vmatpush.msra.mxu3 %v1424_v32  ;;  %v1884_v56 = vsub.f32 %v84_v9, %v1856_v33 }
  0x56   :  { %603 = vmatpush.msra.mxu0 %v1501_v63  ;;  %244 = vmatmul.f32.vlgmr.msra.gmra.mxu1 %v1594_v22 }
  0x57   :  { %693 = vmatpush.msra.mxu2 %v2092_v26  ;;  %644 = vmatpush.msra.mxu1 %v1411_v12  ;;  %v2095_v12 = vand.u32 4294901760, %v1518_v24 }
  0x58   :  { %606 = vmatpush.msra.mxu0 %v1518_v24  ;;  %756 = vmatpush.msra.mxu3 %v1447_v55  ;;  %v2097_v24 = vand.u32 4294901760, %v1537_v35 }
  0x59   :  { %697 = vmatpush.msra.mxu2 %v2093_v57  ;;  %646 = vmatpush.msra.mxu1 %v1424_v32  ;;  %v2096_v32 = vand.u32 4294901760, %v1531_v27 }
  0x5a   :  { %484 = vmatmul.f32.vlgmr.msrb.gmra.mxu2 %v483_v43  ;;  %609 = vmatpush.msra.mxu0 %v1531_v27  ;;  %v92_v27 = vld [vmem:[#allocation5 + $0x170] sm:$0xff] }
  0x5b   :  { %648 = vmatpush.msra.mxu1 %v1447_v55  ;;  %701 = vmatpush.msra.mxu2 %v2094_v39  ;;  %v93_v55 = vld [vmem:[#allocation5 + $0x178] sm:$0xff]  ;;  %v1764_v49 = vand.u32 4294901760, %v92_v27  ;;  %v80_v43 = vld [vmem:[#allocation5 + $0x110] sm:$0xff] }
  0x5c   :  { %758 = vmatpush.msra.mxu3 %v1462_v13  ;;  %406 = vmatmul.f32.vlgmr.msrb.gmra.mxu0 %v1594_v22  ;;  %v1757_v63 = vand.u32 4294901760, %v93_v55 }
  0x5d   :  { %585 = vmatmul.f32.vlgmr.msrb.gmra.mxu3 %v1671_v46  ;;  %612 = vmatpush.msra.mxu0 %v1537_v35 }
  0x5e   :  { %650 = vmatpush.msra.mxu1 %v1462_v13  ;;  %705 = vmatpush.msra.mxu2 %v2095_v12  ;;  %v2100_v13 = vand.u32 4294901760, %v1579_v62 }
  0x5f   :  { %760 = vmatpush.msra.mxu3 %v1475_v30  ;;  %443 = vmatmul.f32.vlgmr.msrb.gmra.mxu1 %v1594_v22  ;;  %v88_v22 = vld [vmem:[#allocation5 + $0x150] sm:$0xff] }
  0x60   :  { %615 = vmatpush.msra.mxu0 %v1549_v45  ;;  %652 = vmatpush.msra.mxu1 %v1475_v30  ;;  %v2098_v30 = vand.u32 4294901760, %v1549_v45  ;;  %v89_v45 = vld [vmem:[#allocation5 + $0x158] sm:$0xff]  ;;  %v1799_v15 = vand.u32 4294901760, %v88_v22 }
  0x61   :  { %709 = vmatpush.msra.mxu2 %v2096_v32  ;;  %762 = vmatpush.msra.mxu3 %v1488_v51 }
  0x62   :  { %618 = vmatpush.msra.mxu0 %v1566_v60  ;;  %654 = vmatpush.msra.mxu1 %v1488_v51  ;;  %v2099_v51 = vand.u32 4294901760, %v1566_v60  ;;  %v1784_v60 = vsub.f32 %v92_v27, %v1764_v49 }
  0x63   :  { %713 = vmatpush.msra.mxu2 %v2097_v24  ;;  %764 = vmatpush.msra.mxu3 %v1503_v28 }
  0x64   :  { %621 = vmatpush.msra.mxu0 %v1579_v62  ;;  %656 = vmatpush.msra.mxu1 %v1503_v28  ;;  %v91_v28 = vld [vmem:[#allocation5 + $0x168] sm:$0xff] }
  0x65   :  { %717 = vmatpush.msra.mxu2 %v2098_v30  ;;  %766 = vmatpush.msra.mxu3 %v1510_v7  ;;  %v1771_v35 = vand.u32 4294901760, %v91_v28  ;;  %v79_v30 = vld [vmem:[#allocation5 + $0x108] sm:$0xff] }
  0x66   :  { %624 = vmatpush.msra.mxu0 %v1592_v61  ;;  %658 = vmatpush.msra.mxu1 %v1510_v7  ;;  %v90_v7 = vld [vmem:[#allocation5 + $0x160] sm:$0xff]  ;;  %v87_v61 = vld [vmem:[#allocation5 + $0x148] sm:$0xff] }
  0x67   :  { %721 = vmatpush.msra.mxu2 %v2099_v51  ;;  %768 = vmatpush.msra.mxu3 %v1523_v23  ;;  %v1906_v51 = vand.u32 4294901760, %v80_v43 }
  0x68   :  { %627 = vmatpush.msra.mxu0 %v1607_v16  ;;  %660 = vmatpush.msra.mxu1 %v1523_v23  ;;  %v1774_v23 = vsub.f32 %v93_v55, %v1757_v63  ;;  %v1795_v16 = vsub.f32 %v91_v28, %v1771_v35  ;;  %v885_v28 = vand.u32 4294901760, %v1884_v56 }
  0x69   :  { %725 = vmatpush.msra.mxu2 %v2100_v13  ;;  %770 = vmatpush.msra.mxu3 %v1544_v31 }
  0x6a   :  { %630 = vmatpush.msra.mxu0 %v1631_v47  ;;  %662 = vmatpush.msra.mxu1 %v1544_v31  ;;  %v1781_v31 = vand.u32 4294901760, %v90_v7  ;;  %v831_v62 = vand.u32 4294901760, %v1774_v23  ;;  %v86_v47 = vld [vmem:[#allocation5 + $0x140] sm:$0xff]  ;;  %v843_v48 = vand.u32 4294901760, %v1795_v16  ;;  %v886_v9 = vsub.f32 %v1884_v56, %v885_v28 }
  0x6b   :  { %729 = vmatpush.msra.mxu2 %v556_v4  ;;  %772 = vmatpush.msra.mxu3 %v1556_v58  ;;  %v1832_v3 = vand.u32 4294901760, %v86_v47 }
  0x6c   :  { %633 = vmatpush.msra.mxu0 %v1644_v38  ;;  %664 = vmatpush.msra.mxu1 %v1556_v58  ;;  %v1791_v58 = vand.u32 4294901760, %v89_v45  ;;  %v1806_v4 = vsub.f32 %v90_v7, %v1781_v31  ;;  %v844_v14 = vsub.f32 %v1795_v16, %v843_v48 }
  0x6d   :  { %733 = vmatpush.msra.mxu2 %v562_v29  ;;  %774 = vmatpush.msra.mxu3 %v1568_v36  ;;  %v1810_v29 = vand.u32 4294901760, %v87_v61  ;;  %v1859_v8 = vsub.f32 %v86_v47, %v1832_v3 }
  0x6e   :  { %636 = vmatpush.msra.mxu0 %v1655_v42  ;;  %666 = vmatpush.msra.mxu1 %v1568_v36  ;;  %v837_v36 = vand.u32 4294901760, %v1784_v60  ;;  %v1820_v38 = vsub.f32 %v89_v45, %v1791_v58  ;;  %v849_v59 = vand.u32 4294901760, %v1806_v4  ;;  %v845_v41 = vand.u32 4294901760, %v844_v14 }
  0x6f   :  { %737 = vmatpush.msra.mxu2 %v568_v5  ;;  %776 = vmatpush.msra.mxu3 %v1581_v1  ;;  %v85_v5 = vld [vmem:[#allocation5 + $0x138] sm:$0xff]  ;;  %v1838_v17 = vsub.f32 %v87_v61, %v1810_v29  ;;  %v873_v0 = vand.u32 4294901760, %v1859_v8  ;;  %v1921_v61 = vand.u32 4294901760, %v79_v30  ;;  %v1935_v14 = vsub.f32 %v80_v43, %v1906_v51 }
  0x70   :  { %639 = vmatmul.f32.vlgmr.msra.gmra.mxu0 %v1688_v40  ;;  %668 = vmatpush.msra.mxu1 %v1581_v1  ;;  %v832_v1 = vsub.f32 %v1774_v23, %v831_v62  ;;  %v838_v42 = vsub.f32 %v1784_v60, %v837_v36  ;;  %v1845_v2 = vand.u32 4294901760, %v85_v5  ;;  %v855_v25 = vand.u32 4294901760, %v1820_v38  ;;  %v102_v40 = vld.sshfl [vmem:[#allocation1 + $0x10] sm:$0xff pattern:$0x73625140] }
  0x71   :  { %789 = vmatpush.msrb.mxu0 %v1757_v63  ;;  %741 = vmatpush.msra.mxu2 %v574_v18  ;;  %v850_v10 = vsub.f32 %v1806_v4, %v849_v59  ;;  %v867_v19 = vand.u32 4294901760, %v1838_v17  ;;  %v1891_v57 = vand.u32 4294901760, %v102_v40  ;;  %v874_v27 = vsub.f32 %v1859_v8, %v873_v0 }
  0x72   :  { %778 = vmatpush.msra.mxu3 %v1604_v37  ;;  %670 = vmatpush.msra.mxu1 %v1604_v37  ;;  %v1825_v37 = vsub.f32 %v88_v22, %v1799_v15  ;;  %v833_v18 = vand.u32 4294901760, %v832_v1  ;;  %v856_v34 = vsub.f32 %v1820_v38, %v855_v25  ;;  %v1872_v44 = vsub.f32 %v85_v5, %v1845_v2  ;;  %v78_v5 = vld [vmem:[#allocation5 + $0x100] sm:$0xff] }
  0x73   :  { %791 = vmatpush.msrb.mxu0 %v1764_v49  ;;  %745 = vmatpush.msra.mxu2 %v580_v20  ;;  %v83_v20 = vld [vmem:[#allocation5 + $0x128] sm:$0xff]  ;;  %v851_v50 = vand.u32 4294901760, %v850_v10  ;;  %v868_v26 = vsub.f32 %v1838_v17, %v867_v19  ;;  %v1915_v45 = vsub.f32 %v102_v40, %v1891_v57  ;;  %v887_v40 = vand.u32 4294901760, %v886_v9 }
  0x74   :  { %780 = vmatpush.msra.mxu3 %v1620_v6  ;;  %747 = vmatmul.f32.vlgmr.msra.gmra.mxu2 %v1671_v46  ;;  %v1869_v11 = vand.u32 4294901760, %v83_v20  ;;  %v857_v39 = vand.u32 4294901760, %v856_v34  ;;  %v879_v32 = vand.u32 4294901760, %v1872_v44  ;;  %v1948_v34 = vsub.f32 %v79_v30, %v1921_v61 }
  0x75   :  { %793 = vmatpush.msrb.mxu0 %v1771_v35  ;;  %932 = vmatpush.msrb.mxu2 %v1774_v23  ;;  %v869_v7 = vand.u32 4294901760, %v868_v26 }
  0x76   :  { %672 = vmatpush.msra.mxu1 %v1620_v6  ;;  %782 = vmatpush.msra.mxu3 %v1633_v21  ;;  %v861_v6 = vand.u32 4294901760, %v1825_v37  ;;  %v1898_v24 = vsub.f32 %v83_v20, %v1869_v11  ;;  %v880_v22 = vsub.f32 %v1872_v44, %v879_v32  ;;  %v1939_v20 = vand.u32 4294901760, %v78_v5 }
  0x77   :  { %784 = vmatmul.f32.vlgmr.msra.gmra.mxu3 %v1671_v46  ;;  %795 = vmatpush.msrb.mxu0 %v1781_v31  ;;  %v839_v46 = vand.u32 4294901760, %v838_v42  ;;  %v875_v42 = vand.u32 4294901760, %v874_v27 }
  0x78   :  { %935 = vmatpush.msrb.mxu2 %v1784_v60  ;;  %985 = vmatpush.msrb.mxu3 %v1757_v63  ;;  %v862_v54 = vsub.f32 %v1825_v37, %v861_v6  ;;  %v891_v47 = vand.u32 4294901760, %v1898_v24  ;;  %v881_v10 = vand.u32 4294901760, %v880_v22  ;;  %v1961_v26 = vsub.f32 %v78_v5, %v1939_v20 }
  0x79   :  { %674 = vmatpush.msra.mxu1 %v1633_v21  ;;  %797 = vmatpush.msrb.mxu0 %v1791_v58  ;;  %v82_v21 = vld [vmem:[#allocation5 + $0x120] sm:$0xff] }
  0x7a   :  { %678 = vmatmul.f32.vlgmr.msra.gmra.mxu1 %v481_v52  ;;  %938 = vmatpush.msrb.mxu2 %v1795_v16  ;;  %v81_v52 = vld [vmem:[#allocation5 + $0x118] sm:$0xff]  ;;  %v1880_v53 = vand.u32 4294901760, %v82_v21  ;;  %v863_v55 = vand.u32 4294901760, %v862_v54  ;;  %v921_v22 = vand.u32 4294901760, %v1961_v26 }
  0x7b   :  { %834 = vmatpush.msrb.mxu1 %v833_v18  ;;  %987 = vmatpush.msrb.mxu3 %v1764_v49  ;;  %v1894_v12 = vand.u32 4294901760, %v81_v52 }
  0x7c   :  { %799 = vmatpush.msrb.mxu0 %v1799_v15  ;;  %941 = vmatpush.msrb.mxu2 %v1806_v4  ;;  %v1910_v13 = vsub.f32 %v82_v21, %v1880_v53  ;;  %v892_v21 = vsub.f32 %v1898_v24, %v891_v47 }
  0x7d   :  { %840 = vmatpush.msrb.mxu1 %v839_v46  ;;  %989 = vmatpush.msrb.mxu3 %v1771_v35  ;;  %v1925_v1 = vsub.f32 %v81_v52, %v1894_v12  ;;  %v822_v46 = vand.u32 4294901760, %v1915_v45  ;;  %v909_v52 = vand.u32 4294901760, %v1935_v14 }
  0x7e   :  { %801 = vmatpush.msrb.mxu0 %v1810_v29  ;;  %944 = vmatpush.msrb.mxu2 %v1820_v38  ;;  %v897_v18 = vand.u32 4294901760, %v1910_v13  ;;  %v893_v43 = vand.u32 4294901760, %v892_v21 }
  0x7f   :  { %846 = vmatpush.msrb.mxu1 %v845_v41  ;;  %991 = vmatpush.msrb.mxu3 %v1781_v31  ;;  %v903_v41 = vand.u32 4294901760, %v1925_v1  ;;  %v910_v27 = vsub.f32 %v1935_v14, %v909_v52 }
  0x80   :  { %803 = vmatpush.msrb.mxu0 %v1832_v3  ;;  %947 = vmatpush.msrb.mxu2 %v1825_v37  ;;  %v898_v54 = vsub.f32 %v1910_v13, %v897_v18 }
  0x81   :  { %852 = vmatpush.msrb.mxu1 %v851_v50  ;;  %993 = vmatpush.msrb.mxu3 %v1791_v58  ;;  %v823_v50 = vsub.f32 %v1915_v45, %v822_v46  ;;  %v911_v9 = vand.u32 4294901760, %v910_v27 }
  0x82   :  { %805 = vmatpush.msrb.mxu0 %v1845_v2  ;;  %950 = vmatpush.msrb.mxu2 %v1838_v17  ;;  %v899_v30 = vand.u32 4294901760, %v898_v54 }
  0x83   :  { %858 = vmatpush.msrb.mxu1 %v857_v39  ;;  %995 = vmatpush.msrb.mxu3 %v1799_v15  ;;  %v904_v39 = vsub.f32 %v1925_v1, %v903_v41 }
  0x84   :  { %807 = vmatpush.msrb.mxu0 %v1856_v33  ;;  %953 = vmatpush.msrb.mxu2 %v1859_v8 }
  0x85   :  { %864 = vmatpush.msrb.mxu1 %v863_v55  ;;  %997 = vmatpush.msrb.mxu3 %v1810_v29  ;;  %v915_v55 = vand.u32 4294901760, %v1948_v34  ;;  %v905_v5 = vand.u32 4294901760, %v904_v39 }
  0x86   :  { %809 = vmatpush.msrb.mxu0 %v1869_v11  ;;  %956 = vmatpush.msrb.mxu2 %v1872_v44 }
  0x87   :  { %870 = vmatpush.msrb.mxu1 %v869_v7  ;;  %999 = vmatpush.msrb.mxu3 %v1832_v3  ;;  %v824_v7 = vand.u32 4294901760, %v823_v50 }
  0x88   :  { %811 = vmatpush.msrb.mxu0 %v1880_v53  ;;  %959 = vmatpush.msrb.mxu2 %v1884_v56 }
  0x89   :  { %876 = vmatpush.msrb.mxu1 %v875_v42  ;;  %1001 = vmatpush.msrb.mxu3 %v1845_v2  ;;  %v916_v42 = vsub.f32 %v1948_v34, %v915_v55 }
  0x8a   :  { %813 = vmatpush.msrb.mxu0 %v1894_v12  ;;  %962 = vmatpush.msrb.mxu2 %v1898_v24 }
  0x8b   :  { %882 = vmatpush.msrb.mxu1 %v881_v10  ;;  %1003 = vmatpush.msrb.mxu3 %v1856_v33  ;;  %v922_v10 = vsub.f32 %v1961_v26, %v921_v22  ;;  %v917_v21 = vand.u32 4294901760, %v916_v42 }
  0x8c   :  { %815 = vmatpush.msrb.mxu0 %v1906_v51  ;;  %965 = vmatpush.msrb.mxu2 %v1910_v13 }
  0x8d   :  { %888 = vmatpush.msrb.mxu1 %v887_v40  ;;  %1005 = vmatpush.msrb.mxu3 %v1869_v11 }
  0x8e   :  { %817 = vmatpush.msrb.mxu0 %v1921_v61  ;;  %968 = vmatpush.msrb.mxu2 %v1925_v1 }
  0x8f   :  { %894 = vmatpush.msrb.mxu1 %v893_v43  ;;  %1007 = vmatpush.msrb.mxu3 %v1880_v53 }
  0x90   :  { %819 = vmatpush.msrb.mxu0 %v1939_v20  ;;  %971 = vmatpush.msrb.mxu2 %v1935_v14 }
  0x91   :  { %900 = vmatpush.msrb.mxu1 %v899_v30  ;;  %1009 = vmatpush.msrb.mxu3 %v1894_v12 }
  0x92   :  { %825 = vmatmul.f32.vlgmr.msrb.gmra.mxu0 %v824_v7  ;;  %974 = vmatpush.msrb.mxu2 %v1948_v34  ;;  %v923_v34 = vand.u32 4294901760, %v922_v10 }
  0x93   :  { %1026 = vmatpush.msra.mxu0 %v831_v62  ;;  %906 = vmatpush.msrb.mxu1 %v905_v5 }
  0x94   :  { %1011 = vmatpush.msrb.mxu3 %v1906_v51  ;;  %977 = vmatpush.msrb.mxu2 %v1961_v26 }
  0x95   :  { %1030 = vmatpush.msra.mxu0 %v837_v36  ;;  %912 = vmatpush.msrb.mxu1 %v911_v9 }
  0x96   :  { %1013 = vmatpush.msrb.mxu3 %v1921_v61  ;;  %980 = vmatmul.f32.vlgmr.msrb.gmra.mxu2 %v1915_v45 }
  0x97   :  { %1034 = vmatpush.msra.mxu0 %v843_v48  ;;  %918 = vmatpush.msrb.mxu1 %v917_v21 }
  0x98   :  { %1015 = vmatpush.msrb.mxu3 %v1939_v20 }
  0x99   :  { %1019 = vmatmul.f32.vlgmr.msrb.gmra.mxu3 %v822_v46  ;;  %1038 = vmatpush.msra.mxu0 %v849_v59 }
  0x9a   :  { %924 = vmatpush.msrb.mxu1 %v923_v34 }
  0x9b   :  { %926 = vmatmul.f32.vlgmr.msrb.gmra.mxu1 %v1891_v57  ;;  %1042 = vmatpush.msra.mxu0 %v855_v25 }
  0x9c   :  { %1093 = vmatpush.msra.mxu1 %v1757_v63  ;;  %v1173_v63 = vld [vmem:[%s2044_s2] ss:$0 sm:$0xff]  ;;  %s1260_s2 = smov [#allocation7]  }
  0x9d   :  { %1046 = vmatpush.msra.mxu0 %v861_v6  ;;  %s1154_s24 = sshll.u32 %s1260_s2, 4  ;;  %s1155_s24 = int_to_ptr.vmem [resolvable:$true] %s1154_s24 }
  0x9e   :  { %1095 = vmatpush.msra.mxu1 %v1764_v49 }
  0x9f   :  { %1050 = vmatpush.msra.mxu0 %v867_v19 }
  0xa0   :  { %1097 = vmatpush.msra.mxu1 %v1771_v35 }
  0xa1   :  { %1054 = vmatpush.msra.mxu0 %v873_v0 }
  0xa2   :  { %1099 = vmatpush.msra.mxu1 %v1781_v31 }
  0xa3   :  { %1058 = vmatpush.msra.mxu0 %v879_v32 }
  0xa4   :  { %1101 = vmatpush.msra.mxu1 %v1791_v58 }
  0xa5   :  { %1062 = vmatpush.msra.mxu0 %v885_v28 }
  0xa6   :  { %1103 = vmatpush.msra.mxu1 %v1799_v15 }
  0xa7   :  { %1066 = vmatpush.msra.mxu0 %v891_v47 }
  0xa8   :  { %1105 = vmatpush.msra.mxu1 %v1810_v29 }
  0xa9   :  { %1070 = vmatpush.msra.mxu0 %v897_v18 }
  0xaa   :  { %1107 = vmatpush.msra.mxu1 %v1832_v3 }
  0xab   :  { %1074 = vmatpush.msra.mxu0 %v903_v41 }
  0xac   :  { %1109 = vmatpush.msra.mxu1 %v1845_v2 }
  0xad   :  { %1078 = vmatpush.msra.mxu0 %v909_v52 }
  0xae   :  { %1111 = vmatpush.msra.mxu1 %v1856_v33 }
  0xaf   :  { %1082 = vmatpush.msra.mxu0 %v915_v55 }
  0xb0   :  { %1113 = vmatpush.msra.mxu1 %v1869_v11 }
  0xb1   :  { %1086 = vmatpush.msra.mxu0 %v921_v22 }
  0xb2   :  { %1115 = vmatpush.msra.mxu1 %v1880_v53  ;;  %1088 = vmatmul.f32.vlgmr.msra.gmra.mxu0 %v1891_v57 }
  0xb4   :  { %1117 = vmatpush.msra.mxu1 %v1894_v12 }
  0xb6   :  { %1119 = vmatpush.msra.mxu1 %v1906_v51 }
  0xb8   :  { %1121 = vmatpush.msra.mxu1 %v1921_v61 }
  0xba   :  { %1123 = vmatpush.msra.mxu1 %v1939_v20 }
  0xbb   :  { %1125 = vmatmul.f32.vlgmr.msra.gmra.mxu1 %v1891_v57 }
  0xc6   :  { %v144_v49 = vpop.f32.mrf.mxu0 }
  0xc7   :  { %v145_v35 = vadd.f32 %v1173_v63, %v144_v49 }
  0xd3   :  { %v245_v23 = vpop.f32.mrf.mxu1 }
  0xd4   :  { %v246_v31 = vadd.f32 %v245_v23, %v145_v35  ;;  %v299_v60 = vpop.f32.mrf.mxu2  ;;  %v338_v62 = vpop.f32.mrf.mxu3 }
  0xd6   :  { %v300_v58 = vadd.f32 %v299_v60, %v246_v31 }
  0xd8   :  { %v339_v16 = vadd.f32 %v338_v62, %v300_v58 }
  0xd9   :  { %v407_v15 = vpop.f32.mrf.mxu0 }
  0xda   :  { %v408_v36 = vadd.f32 %v407_v15, %v339_v16 }
  0xdc   :  { %v444_v4 = vpop.f32.mrf.mxu1 }
  0xdd   :  { %v445_v29 = vadd.f32 %v444_v4, %v408_v36  ;;  %v485_v48 = vpop.f32.mrf.mxu2 }
  0xdf   :  { %v486_v38 = vadd.f32 %v485_v48, %v445_v29 }
  0xe0   :  { %v586_v37 = vpop.f32.mrf.mxu3 }
  0xe1   :  { %v587_v59 = vadd.f32 %v586_v37, %v486_v38 }
  0xed   :  { %v640_v3 = vpop.f32.mrf.mxu0 }
  0xee   :  { %v641_v2 = vadd.f32 %v640_v3, %v587_v59 }
  0xf7   :  { %v679_v17 = vpop.f32.mrf.mxu1  ;;  %v748_v6 = vpop.f32.mrf.mxu2 }
  0xf8   :  { %v680_v25 = vadd.f32 %v679_v17, %v641_v2 }
  0xfa   :  { %v749_v33 = vadd.f32 %v748_v6, %v680_v25  ;;  %v785_v8 = vpop.f32.mrf.mxu3 }
  0xfc   :  { %v786_v11 = vadd.f32 %v785_v8, %v749_v33 }
 0x10f   :  { %v826_v19 = vpop.f32.mrf.mxu0 }
 0x110   :  { %v827_v53 = vadd.f32 %v826_v19, %v786_v11 }
 0x118   :  { %v927_v44 = vpop.f32.mrf.mxu1 }
 0x119   :  { %v928_v0 = vadd.f32 %v927_v44, %v827_v53  ;;  %v981_v56 = vpop.f32.mrf.mxu2 }
 0x11b   :  { %v982_v57 = vadd.f32 %v981_v56, %v928_v0 }
 0x11c   :  { %v1020_v12 = vpop.f32.mrf.mxu3 }
 0x11d   :  { %v1021_v24 = vadd.f32 %v1020_v12, %v982_v57 }
 0x12f   :  { %v1089_v32 = vpop.f32.mrf.mxu0 }
 0x130   :  { %v1090_v51 = vadd.f32 %v1089_v32, %v1021_v24 }
 0x138   :  { %v1126_v28 = vpop.f32.mrf.mxu1 }
 0x139   :  { %v1127_v13 = vadd.f32 %v1126_v28, %v1090_v51 }
 0x13b   :  { %v1167_v45 = vmul.f32 -1.442695, %v1127_v13 }
 0x13d   :  { %1174 = vpow2.f32 %v1167_v45 }
 0x143   :  { %v1175_v61 = vpop.eup %1174 }
 0x144   :  { %v1132_v47 = vadd.f32 1.0, %v1175_v61 }
 0x146   :  { %1176 = vrcp.f32 %v1132_v47  ;;  %v1144_v20 = vand.u32 2147483648, %v1132_v47  ;;  %v1142_v41 = vand.u32 2147483647, %v1132_v47  ;;  %vm1138_vm1 = vweird.f32 %v1132_v47 }
 0x148   :  { %v1145_v54 = vor.u32 1.1754944e-38, %v1144_v20  ;;  %vm1143_vm3 = vcmp.eq.f32.partialorder %v1142_v41, 8.507059e+37 }
 0x14c   :  { %v1177_v1 = vpop.eup %1176 }
 0x14d   :  { %v1134_v18 = vmul.f32 %v1177_v1, %v1132_v47  ;;  %vm1139_vm0 = vweird.f32 %v1177_v1 }
 0x14e   :  { %vm1140_vm2 = vmor %vm1138_vm1, %vm1139_vm0 }
 0x14f   :  { %v1135_v14 = vsub.f32 1.0, %v1134_v18 }
 0x151   :  { %v1136_v46 = vmul.f32 %v1177_v1, %v1135_v14 }
 0x153   :  { %v1137_v40 = vadd.f32 %v1177_v1, %v1136_v46 }
 0x155   :  { %v1141_v52 = vsel %vm1140_vm2, %v1177_v1, %v1137_v40 }
 0x156   :  { %v1146_v50 = vsel %vm1143_vm3, %v1145_v54, %v1141_v52 }
 0x157   :  { %1148 = vst [vmem:[#allocation7] sm:$0x3] %v1146_v50 }
 0x158   :  { %1159 = dma.vmem_to_hbm [thread:$0]  %s1155_s24, 32, %s1157_s27, [#allocation4]  }
 0x159   :  { %1254 = dma.done.wait [#allocation4], 32  }
 0x15a   :  { %1255 = vsyncadd [#allocation4], 4294967264 }
 0x15b   :  { %1164 = vsyncpa [#allocation3], 1 }
 0x15c   :  { %1165 = vsyncpa [#allocation6], 1 }
 0x15d   :  { %1166 = vsyncpa [#allocation4], 1 }

</bundles_post_ra>
